<compile_context>
chip_gen: v7x
topology: tpu7x:2x2x1
jax: 0.10.0
libtpu: 0.0.40
codegen_flags: <defaults>
</compile_context>

<pallas_src>
import jax
import jax.numpy as jnp
import numpy as np
from jax.experimental import pallas as pl
from jax.experimental.pallas import tpu as pltpu


def carb_kernel(x_ref, m1_ref, b1_ref, m2_ref, b2_ref,
                wl1_ref, bl1_ref, wl2_ref, bl2_ref,
                w3a_ref, w3b_ref, b3_ref, out_ref):
    # x_ref / out_ref: (1, H, W*C) lane-dense slab, one batch element per grid step.
    H = x_ref.shape[1]
    x = x_ref[0]                                          # (H, WC)

    # Row-shift matrices: implement the vertical conv taps + vertical zero padding
    # as tiny MXU matmuls (unambiguous, no relayout copies).
    r = jax.lax.broadcasted_iota(jnp.int32, (H, H), 0)
    c = jax.lax.broadcasted_iota(jnp.int32, (H, H), 1)
    s_dn = (r == c + 1).astype(jnp.float32)               # (s_dn @ v)[h] = v[h-1]
    s_up = (r + 1 == c).astype(jnp.float32)               # (s_up @ v)[h] = v[h+1]

    def conv3x3(v, m_ref, b_ref):
        v_dn = jnp.dot(s_dn, v, preferred_element_type=jnp.float32)
        v_up = jnp.dot(s_up, v, preferred_element_type=jnp.float32)
        acc = jnp.dot(v_dn, m_ref[0], preferred_element_type=jnp.float32)
        acc = acc + jnp.dot(v, m_ref[1], preferred_element_type=jnp.float32)
        acc = acc + jnp.dot(v_up, m_ref[2], preferred_element_type=jnp.float32)
        return acc + b_ref[...]

    a = jnp.maximum(conv3x3(x, m1_ref, b1_ref), 0.0)      # conv1[0] + ReLU
    x1 = conv3x3(a, m2_ref, b2_ref)                       # conv1[2]

    # Squeeze-excite. GAP mean is folded into wl1 (packed (WC, C//2));
    # wl2/bl2 are pre-tiled so the sigmoid gate comes out already lane-dense.
    s = jnp.sum(x1, axis=0, keepdims=True)                # (1, WC)
    h = jnp.maximum(
        jnp.dot(s, wl1_ref[...], preferred_element_type=jnp.float32) + bl1_ref[...],
        0.0)                                              # (1, C//2)
    watt = jax.nn.sigmoid(
        jnp.dot(h, wl2_ref[...], preferred_element_type=jnp.float32) + bl2_ref[...])  # (1, WC)

    # concat([x1, x1*w]) @ w3  ==  x1 @ w3a + (x1*w) @ w3b   (block-diag packed 1x1)
    y = (jnp.dot(x1, w3a_ref[...], preferred_element_type=jnp.float32)
         + jnp.dot(x1 * watt, w3b_ref[...], preferred_element_type=jnp.float32)
         + b3_ref[...])

    out_ref[...] = (x + y).reshape(1, H, x.shape[1])      # residual add, full-width store


@jax.jit
def carb_block(x_nchw, params):
    """Pallas CARBBlock forward.  x_nchw: (N, C, H, W) float32 -> (N, C, H, W)."""
    N, C, H, W = x_nchw.shape
    WC = W * C
    w1, b1, w2, b2, wl1, bl1, wl2, bl2, w3, b3 = params

    # Lane-dense layout (N, H, W*C); the trailing reshape after the transpose is free.
    x = jnp.transpose(x_nchw, (0, 2, 3, 1)).reshape(N, H, WC)

    # ---- weight packing (static / trace-time; cached under jit) ----
    band = np.zeros((3, W, W), np.float32)                # band[dw, w_src, w_out]
    for d in range(3):
        for wo in range(W):
            ws = wo + d - 1
            if 0 <= ws < W:
                band[d, ws, wo] = 1.0
    band = jnp.asarray(band)
    eye_w = jnp.eye(W, dtype=jnp.float32)

    def pack3x3(wk):      # (3,3,Cin,Cout) -> (3, W*Cin, W*Cout), block-banded
        return jnp.einsum('dpw,kdio->kpiwo', band, wk).reshape(3, WC, WC)

    def pack1x1(wk):      # (Cin,Cout) -> (W*Cin, W*Cout), block-diagonal
        return jnp.einsum('pw,io->piwo', eye_w, wk).reshape(WC, WC)

    m1 = pack3x3(w1)
    m2 = pack3x3(w2)
    w3a = pack1x1(w3[:C])
    w3b = pack1x1(w3[C:])
    b1r = jnp.tile(b1, (1, W))                            # (1, WC)
    b2r = jnp.tile(b2, (1, W))
    b3r = jnp.tile(b3, (1, W))
    wl1p = jnp.tile(wl1, (W, 1)) * (1.0 / (H * W))        # GAP mean folded into SE weight
    wl2p = jnp.tile(wl2, (1, W))                          # (C//2, WC)
    bl2p = jnp.tile(bl2, (1, W))                          # (1, WC)

    def full_spec(arr):
        nd = arr.ndim
        return pl.BlockSpec(arr.shape, lambda n, _nd=nd: (0,) * _nd)

    grid_spec = pltpu.PrefetchScalarGridSpec(
        num_scalar_prefetch=0,
        grid=(N,),
        in_specs=[
            pl.BlockSpec((1, H, WC), lambda n: (n, 0, 0)),
            full_spec(m1), full_spec(b1r),
            full_spec(m2), full_spec(b2r),
            full_spec(wl1p), full_spec(bl1),
            full_spec(wl2p), full_spec(bl2p),
            full_spec(w3a), full_spec(w3b), full_spec(b3r),
        ],
        out_specs=pl.BlockSpec((1, H, WC), lambda n: (n, 0, 0)),
    )

    out = pl.pallas_call(
        carb_kernel,
        out_shape=jax.ShapeDtypeStruct((N, H, WC), jnp.float32),
        grid_spec=grid_spec,
        compiler_params=pltpu.CompilerParams(
            dimension_semantics=("parallel",)),
    )(x, m1, b1r, m2, b2r, wl1p, bl1, wl2p, bl2p, w3a, w3b, b3r)

    return jnp.transpose(out.reshape(N, H, W, C), (0, 3, 1, 2))


def carb_ref(x_nchw, params):
    """Pure-JAX reference (mirrors the PyTorch forward) for validation."""
    w1, b1, w2, b2, wl1, bl1, wl2, bl2, w3, b3 = params
    x = jnp.transpose(x_nchw, (0, 2, 3, 1))
    dn = ('NHWC', 'HWIO', 'NHWC')
    a = jax.lax.conv_general_dilated(x, w1, (1, 1), 'SAME',
                                     dimension_numbers=dn) + b1.reshape(1, 1, 1, -1)
    a = jax.nn.relu(a)
    x1 = jax.lax.conv_general_dilated(a, w2, (1, 1), 'SAME',
                                      dimension_numbers=dn) + b2.reshape(1, 1, 1, -1)
    g = jnp.mean(x1, axis=(1, 2))                                   # (N, C)
    h = jax.nn.relu(g @ wl1 + bl1)
    watt = jax.nn.sigmoid(h @ wl2 + bl2)                            # (N, C)
    xcat = jnp.concatenate([x1, x1 * watt[:, None, None, :]], axis=-1)
    y = jnp.einsum('nhwc,cd->nhwd', xcat, w3) + b3.reshape(1, 1, 1, -1)
    out = x + y
    return jnp.transpose(out, (0, 3, 1, 2))


if __name__ == "__main__":
    N, C, H, W = 2, 8, 16, 16          # channel_num = 8 -> SE hidden = 4; W*C = 128
    key = jax.random.PRNGKey(0)
    keys = jax.random.split(key, 11)
    s = 0.1
    x = jax.random.normal(keys[0], (N, C, H, W), jnp.float32)
    w1 = s * jax.random.normal(keys[1], (3, 3, C, C), jnp.float32)   # conv1[0], HWIO
    b1 = s * jax.random.normal(keys[2], (1, C), jnp.float32)
    w2 = s * jax.random.normal(keys[3], (3, 3, C, C), jnp.float32)   # conv1[2], HWIO
    b2 = s * jax.random.normal(keys[4], (1, C), jnp.float32)
    wl1 = s * jax.random.normal(keys[5], (C, C // 2), jnp.float32)   # linear[0], (in,out)
    bl1 = s * jax.random.normal(keys[6], (1, C // 2), jnp.float32)
    wl2 = s * jax.random.normal(keys[7], (C // 2, C), jnp.float32)   # linear[2], (in,out)
    bl2 = s * jax.random.normal(keys[8], (1, C), jnp.float32)
    w3 = s * jax.random.normal(keys[9], (2 * C, C), jnp.float32)     # conv2 1x1, (in,out)
    b3 = s * jax.random.normal(keys[10], (1, C), jnp.float32)
    params = (w1, b1, w2, b2, wl1, bl1, wl2, bl2, w3, b3)

    out = jax.block_until_ready(carb_block(x, params))
    ref = jax.block_until_ready(carb_ref(x, params))

    assert out.shape == x.shape and out.dtype == jnp.float32
    # (tolerance loosened slightly: folding GAP/concat into weights reassociates f32 sums)
    if not np.allclose(np.asarray(out), np.asarray(ref), atol=2e-4, rtol=2e-4):
        raise AssertionError("Pallas CARBBlock does not match reference")
    print("KERNEL_OK")
</pallas_src>

<mosaic_0001>
module attributes {stable_mosaic.version = 11 : i64} {
  func.func @carb_kernel(%arg0: i32, %arg1: memref<1x16x128xf32, #tpu.memory_space<vmem>>, %arg2: memref<3x128x128xf32, #tpu.memory_space<vmem>>, %arg3: memref<1x128xf32, #tpu.memory_space<vmem>>, %arg4: memref<3x128x128xf32, #tpu.memory_space<vmem>>, %arg5: memref<1x128xf32, #tpu.memory_space<vmem>>, %arg6: memref<128x4xf32, #tpu.memory_space<vmem>>, %arg7: memref<1x4xf32, #tpu.memory_space<vmem>>, %arg8: memref<4x128xf32, #tpu.memory_space<vmem>>, %arg9: memref<1x128xf32, #tpu.memory_space<vmem>>, %arg10: memref<128x128xf32, #tpu.memory_space<vmem>>, %arg11: memref<128x128xf32, #tpu.memory_space<vmem>>, %arg12: memref<1x128xf32, #tpu.memory_space<vmem>>, %arg13: memref<1x16x128xf32, #tpu.memory_space<vmem>>) attributes {dimension_semantics = [#tpu.dimension_semantics<parallel>], iteration_bounds = array<i64: 2>, scalar_prefetch = 0 : i64, scratch_operands = 0 : i64, tpu.core_type = #tpu.core_type<tc>, window_params = [{transform_indices = @transform_0, window_bounds = array<i64: 1, 16, 128>}, {pipeline_mode = #tpu.pipeline_mode<synchronous>, transform_indices = @transform_1, window_bounds = array<i64: 3, 128, 128>}, {pipeline_mode = #tpu.pipeline_mode<synchronous>, transform_indices = @transform_2, window_bounds = array<i64: 1, 128>}, {pipeline_mode = #tpu.pipeline_mode<synchronous>, transform_indices = @transform_3, window_bounds = array<i64: 3, 128, 128>}, {pipeline_mode = #tpu.pipeline_mode<synchronous>, transform_indices = @transform_4, window_bounds = array<i64: 1, 128>}, {pipeline_mode = #tpu.pipeline_mode<synchronous>, transform_indices = @transform_5, window_bounds = array<i64: 128, 4>}, {pipeline_mode = #tpu.pipeline_mode<synchronous>, transform_indices = @transform_6, window_bounds = array<i64: 1, 4>}, {pipeline_mode = #tpu.pipeline_mode<synchronous>, transform_indices = @transform_7, window_bounds = array<i64: 4, 128>}, {pipeline_mode = #tpu.pipeline_mode<synchronous>, transform_indices = @transform_8, window_bounds = array<i64: 1, 128>}, {pipeline_mode = #tpu.pipeline_mode<synchronous>, transform_indices = @transform_9, window_bounds = array<i64: 128, 128>}, {pipeline_mode = #tpu.pipeline_mode<synchronous>, transform_indices = @transform_10, window_bounds = array<i64: 128, 128>}, {pipeline_mode = #tpu.pipeline_mode<synchronous>, transform_indices = @transform_11, window_bounds = array<i64: 1, 128>}, {transform_indices = @transform_12, window_bounds = array<i64: 1, 16, 128>}]} {
    %c0 = arith.constant 0 : index
    %c0_0 = arith.constant 0 : index
    %c0_1 = arith.constant 0 : index
    %0 = vector.load %arg1[%c0, %c0_0, %c0_1] : memref<1x16x128xf32, #tpu.memory_space<vmem>>, vector<1x16x128xf32>
    %1 = vector.shape_cast %0 : vector<1x16x128xf32> to vector<16x128xf32>
    %2 = tpu.iota {dimensions = array<i32: 0>} : vector<16x16xi32>
    %3 = tpu.iota {dimensions = array<i32: 1>} : vector<16x16xi32>
    %c1_i32 = arith.constant 1 : i32
    %4 = vector.broadcast %c1_i32 : i32 to vector<16x16xi32>
    %5 = arith.addi %3, %4 : vector<16x16xi32>
    %6 = arith.cmpi eq, %2, %5 : vector<16x16xi32>
    %7 = arith.extui %6 : vector<16x16xi1> to vector<16x16xi32>
    %8 = arith.sitofp %7 : vector<16x16xi32> to vector<16x16xf32>
    %c1_i32_2 = arith.constant 1 : i32
    %9 = vector.broadcast %c1_i32_2 : i32 to vector<16x16xi32>
    %10 = arith.addi %2, %9 : vector<16x16xi32>
    %11 = arith.cmpi eq, %10, %3 : vector<16x16xi32>
    %12 = arith.extui %11 : vector<16x16xi1> to vector<16x16xi32>
    %13 = arith.sitofp %12 : vector<16x16xi32> to vector<16x16xf32>
    %cst = arith.constant dense<0.000000e+00> : vector<16x128xf32>
    %14 = tpu.matmul %8, %1, %cst {dimension_numbers = #tpu.dot_dimension_numbers<[1], [0], [0], [1], [0, 0, 1, 1], [], []>} : vector<16x16xf32>, vector<16x128xf32>, vector<16x128xf32> -> vector<16x128xf32>
    %cst_3 = arith.constant dense<0.000000e+00> : vector<16x128xf32>
    %15 = tpu.matmul %13, %1, %cst_3 {dimension_numbers = #tpu.dot_dimension_numbers<[1], [0], [0], [1], [0, 0, 1, 1], [], []>} : vector<16x16xf32>, vector<16x128xf32>, vector<16x128xf32> -> vector<16x128xf32>
    %c0_4 = arith.constant 0 : index
    %c0_5 = arith.constant 0 : index
    %c0_6 = arith.constant 0 : index
    %16 = vector.load %arg2[%c0_4, %c0_5, %c0_6] : memref<3x128x128xf32, #tpu.memory_space<vmem>>, vector<1x128x128xf32>
    %17 = vector.shape_cast %16 : vector<1x128x128xf32> to vector<128x128xf32>
    %cst_7 = arith.constant dense<0.000000e+00> : vector<16x128xf32>
    %18 = tpu.matmul %14, %17, %cst_7 {dimension_numbers = #tpu.dot_dimension_numbers<[1], [0], [0], [1], [0, 0, 1, 1], [], []>} : vector<16x128xf32>, vector<128x128xf32>, vector<16x128xf32> -> vector<16x128xf32>
    %c1 = arith.constant 1 : index
    %c0_8 = arith.constant 0 : index
    %c0_9 = arith.constant 0 : index
    %19 = vector.load %arg2[%c1, %c0_8, %c0_9] : memref<3x128x128xf32, #tpu.memory_space<vmem>>, vector<1x128x128xf32>
    %20 = vector.shape_cast %19 : vector<1x128x128xf32> to vector<128x128xf32>
    %cst_10 = arith.constant dense<0.000000e+00> : vector<16x128xf32>
    %21 = tpu.matmul %1, %20, %cst_10 {dimension_numbers = #tpu.dot_dimension_numbers<[1], [0], [0], [1], [0, 0, 1, 1], [], []>} : vector<16x128xf32>, vector<128x128xf32>, vector<16x128xf32> -> vector<16x128xf32>
    %22 = arith.addf %18, %21 : vector<16x128xf32>
    %c2 = arith.constant 2 : index
    %c0_11 = arith.constant 0 : index
    %c0_12 = arith.constant 0 : index
    %23 = vector.load %arg2[%c2, %c0_11, %c0_12] : memref<3x128x128xf32, #tpu.memory_space<vmem>>, vector<1x128x128xf32>
    %24 = vector.shape_cast %23 : vector<1x128x128xf32> to vector<128x128xf32>
    %cst_13 = arith.constant dense<0.000000e+00> : vector<16x128xf32>
    %25 = tpu.matmul %15, %24, %cst_13 {dimension_numbers = #tpu.dot_dimension_numbers<[1], [0], [0], [1], [0, 0, 1, 1], [], []>} : vector<16x128xf32>, vector<128x128xf32>, vector<16x128xf32> -> vector<16x128xf32>
    %26 = arith.addf %22, %25 : vector<16x128xf32>
    %c0_14 = arith.constant 0 : index
    %c0_15 = arith.constant 0 : index
    %27 = vector.load %arg3[%c0_14, %c0_15] : memref<1x128xf32, #tpu.memory_space<vmem>>, vector<1x128xf32>
    %28 = vector.broadcast %27 : vector<1x128xf32> to vector<16x128xf32>
    %29 = arith.addf %26, %28 : vector<16x128xf32>
    %cst_16 = arith.constant 0.000000e+00 : f32
    %30 = vector.broadcast %cst_16 : f32 to vector<16x128xf32>
    %31 = arith.maximumf %29, %30 : vector<16x128xf32>
    %cst_17 = arith.constant dense<0.000000e+00> : vector<16x128xf32>
    %32 = tpu.matmul %8, %31, %cst_17 {dimension_numbers = #tpu.dot_dimension_numbers<[1], [0], [0], [1], [0, 0, 1, 1], [], []>} : vector<16x16xf32>, vector<16x128xf32>, vector<16x128xf32> -> vector<16x128xf32>
    %cst_18 = arith.constant dense<0.000000e+00> : vector<16x128xf32>
    %33 = tpu.matmul %13, %31, %cst_18 {dimension_numbers = #tpu.dot_dimension_numbers<[1], [0], [0], [1], [0, 0, 1, 1], [], []>} : vector<16x16xf32>, vector<16x128xf32>, vector<16x128xf32> -> vector<16x128xf32>
    %c0_19 = arith.constant 0 : index
    %c0_20 = arith.constant 0 : index
    %c0_21 = arith.constant 0 : index
    %34 = vector.load %arg4[%c0_19, %c0_20, %c0_21] : memref<3x128x128xf32, #tpu.memory_space<vmem>>, vector<1x128x128xf32>
    %35 = vector.shape_cast %34 : vector<1x128x128xf32> to vector<128x128xf32>
    %cst_22 = arith.constant dense<0.000000e+00> : vector<16x128xf32>
    %36 = tpu.matmul %32, %35, %cst_22 {dimension_numbers = #tpu.dot_dimension_numbers<[1], [0], [0], [1], [0, 0, 1, 1], [], []>} : vector<16x128xf32>, vector<128x128xf32>, vector<16x128xf32> -> vector<16x128xf32>
    %c1_23 = arith.constant 1 : index
    %c0_24 = arith.constant 0 : index
    %c0_25 = arith.constant 0 : index
    %37 = vector.load %arg4[%c1_23, %c0_24, %c0_25] : memref<3x128x128xf32, #tpu.memory_space<vmem>>, vector<1x128x128xf32>
    %38 = vector.shape_cast %37 : vector<1x128x128xf32> to vector<128x128xf32>
    %cst_26 = arith.constant dense<0.000000e+00> : vector<16x128xf32>
    %39 = tpu.matmul %31, %38, %cst_26 {dimension_numbers = #tpu.dot_dimension_numbers<[1], [0], [0], [1], [0, 0, 1, 1], [], []>} : vector<16x128xf32>, vector<128x128xf32>, vector<16x128xf32> -> vector<16x128xf32>
    %40 = arith.addf %36, %39 : vector<16x128xf32>
    %c2_27 = arith.constant 2 : index
    %c0_28 = arith.constant 0 : index
    %c0_29 = arith.constant 0 : index
    %41 = vector.load %arg4[%c2_27, %c0_28, %c0_29] : memref<3x128x128xf32, #tpu.memory_space<vmem>>, vector<1x128x128xf32>
    %42 = vector.shape_cast %41 : vector<1x128x128xf32> to vector<128x128xf32>
    %cst_30 = arith.constant dense<0.000000e+00> : vector<16x128xf32>
    %43 = tpu.matmul %33, %42, %cst_30 {dimension_numbers = #tpu.dot_dimension_numbers<[1], [0], [0], [1], [0, 0, 1, 1], [], []>} : vector<16x128xf32>, vector<128x128xf32>, vector<16x128xf32> -> vector<16x128xf32>
    %44 = arith.addf %40, %43 : vector<16x128xf32>
    %c0_31 = arith.constant 0 : index
    %c0_32 = arith.constant 0 : index
    %45 = vector.load %arg5[%c0_31, %c0_32] : memref<1x128xf32, #tpu.memory_space<vmem>>, vector<1x128xf32>
    %46 = vector.broadcast %45 : vector<1x128xf32> to vector<16x128xf32>
    %47 = arith.addf %44, %46 : vector<16x128xf32>
    %cst_33 = arith.constant dense<0.000000e+00> : vector<128xf32>
    %48 = vector.multi_reduction <add>, %47, %cst_33 [0] : vector<16x128xf32> to vector<128xf32>
    %49 = vector.shape_cast %48 : vector<128xf32> to vector<1x128xf32>
    %c0_34 = arith.constant 0 : index
    %c0_35 = arith.constant 0 : index
    %50 = vector.load %arg6[%c0_34, %c0_35] : memref<128x4xf32, #tpu.memory_space<vmem>>, vector<128x4xf32>
    %cst_36 = arith.constant dense<0.000000e+00> : vector<1x4xf32>
    %51 = tpu.matmul %49, %50, %cst_36 {dimension_numbers = #tpu.dot_dimension_numbers<[1], [0], [0], [1], [0, 0, 1, 1], [], []>} : vector<1x128xf32>, vector<128x4xf32>, vector<1x4xf32> -> vector<1x4xf32>
    %c0_37 = arith.constant 0 : index
    %c0_38 = arith.constant 0 : index
    %52 = vector.load %arg7[%c0_37, %c0_38] : memref<1x4xf32, #tpu.memory_space<vmem>>, vector<1x4xf32>
    %53 = arith.addf %51, %52 : vector<1x4xf32>
    %cst_39 = arith.constant 0.000000e+00 : f32
    %54 = vector.broadcast %cst_39 : f32 to vector<1x4xf32>
    %55 = arith.maximumf %53, %54 : vector<1x4xf32>
    %c0_40 = arith.constant 0 : index
    %c0_41 = arith.constant 0 : index
    %56 = vector.load %arg8[%c0_40, %c0_41] : memref<4x128xf32, #tpu.memory_space<vmem>>, vector<4x128xf32>
    %cst_42 = arith.constant dense<0.000000e+00> : vector<1x128xf32>
    %57 = tpu.matmul %55, %56, %cst_42 {dimension_numbers = #tpu.dot_dimension_numbers<[1], [0], [0], [1], [0, 0, 1, 1], [], []>} : vector<1x4xf32>, vector<4x128xf32>, vector<1x128xf32> -> vector<1x128xf32>
    %c0_43 = arith.constant 0 : index
    %c0_44 = arith.constant 0 : index
    %58 = vector.load %arg9[%c0_43, %c0_44] : memref<1x128xf32, #tpu.memory_space<vmem>>, vector<1x128xf32>
    %59 = arith.addf %57, %58 : vector<1x128xf32>
    %60 = arith.negf %59 : vector<1x128xf32>
    %61 = math.exp %60 : vector<1x128xf32>
    %cst_45 = arith.constant 1.000000e+00 : f32
    %62 = vector.broadcast %cst_45 : f32 to vector<1x128xf32>
    %63 = arith.addf %62, %61 : vector<1x128xf32>
    %64 = arith.divf %62, %63 : vector<1x128xf32>
    %c0_46 = arith.constant 0 : index
    %c0_47 = arith.constant 0 : index
    %65 = vector.load %arg10[%c0_46, %c0_47] : memref<128x128xf32, #tpu.memory_space<vmem>>, vector<128x128xf32>
    %cst_48 = arith.constant dense<0.000000e+00> : vector<16x128xf32>
    %66 = tpu.matmul %47, %65, %cst_48 {dimension_numbers = #tpu.dot_dimension_numbers<[1], [0], [0], [1], [0, 0, 1, 1], [], []>} : vector<16x128xf32>, vector<128x128xf32>, vector<16x128xf32> -> vector<16x128xf32>
    %67 = vector.broadcast %64 : vector<1x128xf32> to vector<16x128xf32>
    %68 = arith.mulf %47, %67 : vector<16x128xf32>
    %c0_49 = arith.constant 0 : index
    %c0_50 = arith.constant 0 : index
    %69 = vector.load %arg11[%c0_49, %c0_50] : memref<128x128xf32, #tpu.memory_space<vmem>>, vector<128x128xf32>
    %cst_51 = arith.constant dense<0.000000e+00> : vector<16x128xf32>
    %70 = tpu.matmul %68, %69, %cst_51 {dimension_numbers = #tpu.dot_dimension_numbers<[1], [0], [0], [1], [0, 0, 1, 1], [], []>} : vector<16x128xf32>, vector<128x128xf32>, vector<16x128xf32> -> vector<16x128xf32>
    %71 = arith.addf %66, %70 : vector<16x128xf32>
    %c0_52 = arith.constant 0 : index
    %c0_53 = arith.constant 0 : index
    %72 = vector.load %arg12[%c0_52, %c0_53] : memref<1x128xf32, #tpu.memory_space<vmem>>, vector<1x128xf32>
    %73 = vector.broadcast %72 : vector<1x128xf32> to vector<16x128xf32>
    %74 = arith.addf %71, %73 : vector<16x128xf32>
    %75 = arith.addf %1, %74 : vector<16x128xf32>
    %76 = vector.shape_cast %75 : vector<16x128xf32> to vector<1x16x128xf32>
    %c0_54 = arith.constant 0 : index
    %c0_55 = arith.constant 0 : index
    %c0_56 = arith.constant 0 : index
    %77 = vector.load %arg13[%c0_54, %c0_55, %c0_56] : memref<1x16x128xf32, #tpu.memory_space<vmem>>, vector<1x16x128xf32>
    tpu.vector_store %arg13[%c0_54, %c0_55, %c0_56], %76 {strides = array<i32>} : memref<1x16x128xf32, #tpu.memory_space<vmem>>, vector<1x16x128xf32>,
    return
  }
  func.func @transform_0(%arg0: i32) -> (i32, i32, i32) {
    %c0_i32 = arith.constant 0 : i32
    %c0_i32_0 = arith.constant 0 : i32
    %c0_i32_1 = arith.constant 0 : i32
    return %arg0, %c0_i32, %c0_i32_0 : i32, i32, i32
  }
  func.func @transform_1(%arg0: i32) -> (i32, i32, i32) {
    %c0_i32 = arith.constant 0 : i32
    %c0_i32_0 = arith.constant 0 : i32
    %c0_i32_1 = arith.constant 0 : i32
    %c0_i32_2 = arith.constant 0 : i32
    return %c0_i32, %c0_i32_0, %c0_i32_1 : i32, i32, i32
  }
  func.func @transform_2(%arg0: i32) -> (i32, i32) {
    %c0_i32 = arith.constant 0 : i32
    %c0_i32_0 = arith.constant 0 : i32
    %c0_i32_1 = arith.constant 0 : i32
    return %c0_i32, %c0_i32_0 : i32, i32
  }
  func.func @transform_3(%arg0: i32) -> (i32, i32, i32) {
    %c0_i32 = arith.constant 0 : i32
    %c0_i32_0 = arith.constant 0 : i32
    %c0_i32_1 = arith.constant 0 : i32
    %c0_i32_2 = arith.constant 0 : i32
    return %c0_i32, %c0_i32_0, %c0_i32_1 : i32, i32, i32
  }
  func.func @transform_4(%arg0: i32) -> (i32, i32) {
    %c0_i32 = arith.constant 0 : i32
    %c0_i32_0 = arith.constant 0 : i32
    %c0_i32_1 = arith.constant 0 : i32
    return %c0_i32, %c0_i32_0 : i32, i32
  }
  func.func @transform_5(%arg0: i32) -> (i32, i32) {
    %c0_i32 = arith.constant 0 : i32
    %c0_i32_0 = arith.constant 0 : i32
    %c0_i32_1 = arith.constant 0 : i32
    return %c0_i32, %c0_i32_0 : i32, i32
  }
  func.func @transform_6(%arg0: i32) -> (i32, i32) {
    %c0_i32 = arith.constant 0 : i32
    %c0_i32_0 = arith.constant 0 : i32
    %c0_i32_1 = arith.constant 0 : i32
    return %c0_i32, %c0_i32_0 : i32, i32
  }
  func.func @transform_7(%arg0: i32) -> (i32, i32) {
    %c0_i32 = arith.constant 0 : i32
    %c0_i32_0 = arith.constant 0 : i32
    %c0_i32_1 = arith.constant 0 : i32
    return %c0_i32, %c0_i32_0 : i32, i32
  }
  func.func @transform_8(%arg0: i32) -> (i32, i32) {
    %c0_i32 = arith.constant 0 : i32
    %c0_i32_0 = arith.constant 0 : i32
    %c0_i32_1 = arith.constant 0 : i32
    return %c0_i32, %c0_i32_0 : i32, i32
  }
  func.func @transform_9(%arg0: i32) -> (i32, i32) {
    %c0_i32 = arith.constant 0 : i32
    %c0_i32_0 = arith.constant 0 : i32
    %c0_i32_1 = arith.constant 0 : i32
    return %c0_i32, %c0_i32_0 : i32, i32
  }
  func.func @transform_10(%arg0: i32) -> (i32, i32) {
    %c0_i32 = arith.constant 0 : i32
    %c0_i32_0 = arith.constant 0 : i32
    %c0_i32_1 = arith.constant 0 : i32
    return %c0_i32, %c0_i32_0 : i32, i32
  }
  func.func @transform_11(%arg0: i32) -> (i32, i32) {
    %c0_i32 = arith.constant 0 : i32
    %c0_i32_0 = arith.constant 0 : i32
    %c0_i32_1 = arith.constant 0 : i32
    return %c0_i32, %c0_i32_0 : i32, i32
  }
  func.func @transform_12(%arg0: i32) -> (i32, i32, i32) {
    %c0_i32 = arith.constant 0 : i32
    %c0_i32_0 = arith.constant 0 : i32
    %c0_i32_1 = arith.constant 0 : i32
    return %arg0, %c0_i32, %c0_i32_0 : i32, i32, i32
  }
}

</mosaic_0001>

<bundles_post_ra>
// kernel: tile.54
= control target key start
LH: loop header
LB: loop body
LE: loop exit
PB: predicated region body
PF: predicated region fallthrough
CT: control target
= control target key end

     0   :  { %vm6_vm0 = vcmask 1043458   ;;  %s11_s6 = smov 3  ;;  %s14_s7 = smov 12  ;;  %vm8_vm1 = vcmask 64512   ;;  %vm20_vm2 = vcmask 1048512   ;;  %vm32_vm3 = vcmask 982912   ;;  %s381_s0 = inlined_call_operand.vmem [shape: f32[4,16,8], index: 0, kind: input, shape index: {}]   ;;  %s382_s1 = inlined_call_operand.vmem [shape: f32[4,128], index: 1, kind: output, shape index: {}]  }
   0x1   :  { %v196_v0 = vld [vmem:[%s381_s0 + $0xf] ss:$16 sm:%s11_s6]   ;;  %s35_s12 = smov 3  ;;  %s38_s15 = smov 12  ;;  %vm44_vm4 = vcmask 917312   ;;  %vm56_vm5 = vcmask 851712  }
   0x2   :  { %v197_v1 = vld [vmem:[%s381_s0 + $0xf] ss:$16 sm:%s14_s7]   ;;  %v200_v3 = vld [vmem:[%s381_s0 + $0xd] ss:$16 sm:%s35_s12]   ;;  %s241_s16 = smov 120   ;;  %s23_s19 = smov 3 }
   0x3   :  { %v17_v2 = vsel %vm6_vm0, %v197_v1, %v196_v0  ;;  %v201_v4 = vld [vmem:[%s381_s0 + $0xd] ss:$16 sm:%s38_s15]   ;;  %s26_s20 = smov 12  ;;  %v198_v6 = vld [vmem:[%s381_s0 + $0xe] ss:$16 sm:%s23_s19]   ;;  %s47_s25 = smov 3 }
   0x4   :  { %18 = vrot.lane.b32.xlu0 %v17_v2, %s241_s16  ;;  %v41_v5 = vsel %vm6_vm0, %v201_v4, %v200_v3  ;;  %v199_v7 = vld [vmem:[%s381_s0 + $0xe] ss:$16 sm:%s26_s20]   ;;  %s242_s26 = smov 104   ;;  %s50_s29 = smov 12  ;;  %vm68_vm6 = vcmask 786112   ;;  %vm80_vm7 = vcmask 720512  }
   0x5   :  { %42 = vrot.lane.b32.xlu1 %v41_v5, %s242_s26  ;;  %v29_v8 = vsel %vm6_vm0, %v199_v7, %v198_v6  ;;  %v202_v9 = vld [vmem:[%s381_s0 + $0xc] ss:$16 sm:%s47_s25]   ;;  %s59_s3 = smov 3  ;;  %s62_s4 = smov 12  ;;  %vm92_vm8 = vcmask 654912   ;;  %vm104_vm9 = vcmask 589312  }
   0x6   :  { %v203_v10 = vld [vmem:[%s381_s0 + $0xc] ss:$16 sm:%s50_s29]   ;;  %s243_s5 = smov 112   ;;  %v204_v12 = vld [vmem:[%s381_s0 + $0xb] ss:$16 sm:%s59_s3]   ;;  %s71_s8 = smov 3 }
   0x7   :  { %v53_v11 = vsel %vm6_vm0, %v203_v10, %v202_v9  ;;  %v205_v13 = vld [vmem:[%s381_s0 + $0xb] ss:$16 sm:%s62_s4]   ;;  %v206_v14 = vld [vmem:[%s381_s0 + $0xa] ss:$16 sm:%s71_s8]   ;;  %s74_s13 = smov 12  ;;  %s244_s14 = smov 96  }
   0x8   :  { %30 = vrot.lane.b32.xlu0 %v29_v8, %s243_s5  ;;  %v65_v15 = vsel %vm6_vm0, %v205_v13, %v204_v12  ;;  %v207_v16 = vld [vmem:[%s381_s0 + $0xa] ss:$16 sm:%s74_s13]   ;;  %s83_s17 = smov 3  ;;  %s86_s18 = smov 12  ;;  %vm116_vm10 = vcmask 523712   ;;  %vm128_vm11 = vcmask 458112  }
   0x9   :  { %54 = vrot.lane.b32.xlu1 %v53_v11, %s244_s14  ;;  %v77_v17 = vsel %vm6_vm0, %v207_v16, %v206_v14  ;;  %v208_v18 = vld [vmem:[%s381_s0 + $0x9] ss:$16 sm:%s83_s17]   ;;  %s95_s23 = smov 3  ;;  %s245_s24 = smov 88   ;;  %vm140_vm12 = vcmask 392512   ;;  %vm152_vm13 = vcmask 326912  }
   0xa   :  { %v209_v19 = vld [vmem:[%s381_s0 + $0x9] ss:$16 sm:%s86_s18]   ;;  %v210_v20 = vld [vmem:[%s381_s0 + $0x8] ss:$16 sm:%s95_s23]   ;;  %s98_s27 = smov 12  ;;  %s107_s30 = smov 3 }
   0xb   :  { %v89_v21 = vsel %vm6_vm0, %v209_v19, %v208_v18  ;;  %v211_v22 = vld [vmem:[%s381_s0 + $0x8] ss:$16 sm:%s98_s27]   ;;  %s110_s2 = smov 12  ;;  %s246_s3 = smov 80   ;;  %v212_v23 = vld [vmem:[%s381_s0 + $0x7] ss:$16 sm:%s107_s30]  }
   0xc   :  { %66 = vrot.lane.b32.xlu0 %v65_v15, %s245_s24  ;;  %s119_s6 = smov 3  ;;  %v101_v24 = vsel %vm6_vm0, %v211_v22, %v210_v20  ;;  %v213_v25 = vld [vmem:[%s381_s0 + $0x7] ss:$16 sm:%s110_s2]   ;;  %s122_s11 = smov 12  ;;  %vm164_vm14 = vcmask 261312   ;;  %vm176_vm15 = vcmask 195712  }
   0xd   :  { %78 = vrot.lane.b32.xlu1 %v77_v17, %s246_s3  ;;  %v214_v26 = vld [vmem:[%s381_s0 + $0x6] ss:$16 sm:%s119_s6]   ;;  %s247_s12 = smov 72   ;;  %s131_s15 = smov 3  ;;  %v113_v28 = vsel %vm6_vm0, %v213_v25, %v212_v23 }
   0xe   :  { %v215_v27 = vld [vmem:[%s381_s0 + $0x6] ss:$16 sm:%s122_s11]   ;;  %s134_s16 = smov 12  ;;  %v216_v29 = vld [vmem:[%s381_s0 + $0x5] ss:$16 sm:%s131_s15]   ;;  %s143_s19 = smov 3 }
   0xf   :  { %s248_s20 = smov 64   ;;  %v217_v30 = vld [vmem:[%s381_s0 + $0x5] ss:$16 sm:%s134_s16]   ;;  %s146_s23 = smov 12  ;;  %v125_v31 = vsel %vm6_vm0, %v215_v27, %v214_v26  ;;  %v218_v32 = vld [vmem:[%s381_s0 + $0x4] ss:$16 sm:%s143_s19]  }
  0x10   :  { %90 = vrot.lane.b32.xlu0 %v89_v21, %s247_s12  ;;  %s155_s26 = smov 3  ;;  %s158_s27 = smov 12  ;;  %v219_v33 = vld [vmem:[%s381_s0 + $0x4] ss:$16 sm:%s146_s23]   ;;  %v137_v34 = vsel %vm6_vm0, %v217_v30, %v216_v29 }
  0x11   :  { %102 = vrot.lane.b32.xlu1 %v101_v24, %s248_s20  ;;  %s249_s28 = smov 56   ;;  %s167_s2 = smov 3  ;;  %v220_v35 = vld [vmem:[%s381_s0 + $0x3] ss:$16 sm:%s155_s26]   ;;  %v149_v37 = vsel %vm6_vm0, %v219_v33, %v218_v32 }
  0x12   :  { %s170_s5 = smov 12  ;;  %s250_s6 = smov 48   ;;  %v221_v36 = vld [vmem:[%s381_s0 + $0x3] ss:$16 sm:%s158_s27]   ;;  %v222_v38 = vld [vmem:[%s381_s0 + $0x2] ss:$16 sm:%s167_s2]  }
  0x13   :  { %s179_s9 = smov 3  ;;  %v223_v39 = vld [vmem:[%s381_s0 + $0x2] ss:$16 sm:%s170_s5]   ;;  %s182_s14 = smov 12  ;;  %v161_v41 = vsel %vm6_vm0, %v221_v36, %v220_v35 }
  0x14   :  { %114 = vrot.lane.b32.xlu0 %v113_v28, %s249_s28  ;;  %s2_s15 = smov 3  ;;  %s251_s16 = smov 40   ;;  %v224_v42 = vld [vmem:[%s381_s0 + $0x1] ss:$16 sm:%s179_s9]   ;;  %v173_v46 = vsel %vm6_vm0, %v223_v39, %v222_v38 }
  0x15   :  { %126 = vrot.lane.b32.xlu1 %v125_v31, %s250_s6  ;;  %v3_v40 = vld [vmem:[%s381_s0] ss:$16 sm:%s2_s15]   ;;  %s4_s19 = smov 12  ;;  %s252_s24 = smov 32  }
  0x16   :  { %v5_v43 = vld [vmem:[%s381_s0] ss:$16 sm:%s4_s19]   ;;  %v225_v44 = vld [vmem:[%s381_s0 + $0x1] ss:$16 sm:%s182_s14]   ;;  %s253_s0 = smov 24   ;;  %s254_s27 = smov 16  }
  0x17   :  { %v7_v45 = vsel %vm6_vm0, %v5_v43, %v3_v40  ;;  %v185_v47 = vsel %vm6_vm0, %v225_v44, %v224_v42  ;;  %s255_s28 = smov 8   ;;  %vm188_vm0 = vcmask 130112  }
  0x18   :  { %138 = vrot.lane.b32.xlu0 %v137_v34, %s251_s16  ;;  %9 = vst.msk [vmem:[#allocation0] sm:$0xf] %vm8_vm1, %v7_v45  }
  0x19   :  { %150 = vrot.lane.b32.xlu1 %v149_v37, %s252_s24 }
  0x1c   :  { %162 = vrot.lane.b32.xlu0 %v161_v41, %s253_s0 }
  0x1d   :  { %174 = vrot.lane.b32.xlu1 %v173_v46, %s254_s27 }
  0x20   :  { %186 = vrot.lane.b32.xlu0 %v185_v47, %s255_s28 }
  0x76   :  { %v19_v48 = vpop.permute.xlu0 %18  }
  0x77   :  { %21 = vst.msk [vmem:[#allocation0] sm:$0xf] %vm20_vm2, %v19_v48   ;;  %v43_v49 = vpop.permute.xlu1 %42  }
  0x7a   :  { %v31_v50 = vpop.permute.xlu0 %30  }
  0x7b   :  { %33 = vst.msk [vmem:[#allocation0] sm:$0xf] %vm32_vm3, %v31_v50   ;;  %v55_v51 = vpop.permute.xlu1 %54  }
  0x7c   :  { %45 = vst.msk [vmem:[#allocation0] sm:$0xf] %vm44_vm4, %v43_v49  }
  0x7d   :  { %57 = vst.msk [vmem:[#allocation0] sm:$0xf] %vm56_vm5, %v55_v51  }
  0x7e   :  { %v67_v52 = vpop.permute.xlu0 %66  }
  0x7f   :  { %69 = vst.msk [vmem:[#allocation0] sm:$0xf] %vm68_vm6, %v67_v52   ;;  %v79_v53 = vpop.permute.xlu1 %78  }
  0x80   :  { %81 = vst.msk [vmem:[#allocation0] sm:$0xf] %vm80_vm7, %v79_v53  }
  0x82   :  { %v91_v54 = vpop.permute.xlu0 %90  }
  0x83   :  { %93 = vst.msk [vmem:[#allocation0] sm:$0xf] %vm92_vm8, %v91_v54   ;;  %v103_v55 = vpop.permute.xlu1 %102  }
  0x84   :  { %105 = vst.msk [vmem:[#allocation0] sm:$0xf] %vm104_vm9, %v103_v55  }
  0x86   :  { %v115_v56 = vpop.permute.xlu0 %114  }
  0x87   :  { %117 = vst.msk [vmem:[#allocation0] sm:$0xf] %vm116_vm10, %v115_v56   ;;  %v127_v57 = vpop.permute.xlu1 %126  }
  0x88   :  { %129 = vst.msk [vmem:[#allocation0] sm:$0xf] %vm128_vm11, %v127_v57  }
  0x8a   :  { %v139_v58 = vpop.permute.xlu0 %138  }
  0x8b   :  { %141 = vst.msk [vmem:[#allocation0] sm:$0xf] %vm140_vm12, %v139_v58   ;;  %v151_v59 = vpop.permute.xlu1 %150  }
  0x8c   :  { %153 = vst.msk [vmem:[#allocation0] sm:$0xf] %vm152_vm13, %v151_v59  }
  0x8e   :  { %v163_v60 = vpop.permute.xlu0 %162  }
  0x8f   :  { %165 = vst.msk [vmem:[#allocation0] sm:$0xf] %vm164_vm14, %v163_v60   ;;  %v175_v61 = vpop.permute.xlu1 %174  }
  0x90   :  { %177 = vst.msk [vmem:[#allocation0] sm:$0xf] %vm176_vm15, %v175_v61  }
  0x92   :  { %v187_v62 = vpop.permute.xlu0 %186  }
  0x93   :  { %189 = vst.msk [vmem:[#allocation0] sm:$0xf] %vm188_vm0, %v187_v62  }
  0x9a   :  { %v193_v63 = vld [vmem:[#allocation0] sm:$0xf] }
  0x9b   :  { %195 = vst [vmem:[%s382_s1] sm:$0xf] %v193_v63 }

// kernel: carb_block.1
= control target key start
LH: loop header
LB: loop body
LE: loop exit
PB: predicated region body
PF: predicated region fallthrough
CT: control target
= control target key end

     0   :  { %s2779_s21 = smov 0   ;;  %s3320_s0 = inlined_call_operand.vmem [shape: f32[2,16,128], index: 0, kind: input, shape index: {}]   ;;  %s3321_s1 = inlined_call_operand.vmem [shape: f32[3,128,128], index: 1, kind: input, shape index: {}]   ;;  %s3322_s2 = inlined_call_operand.vmem [shape: f32[1,128], index: 2, kind: input, shape index: {}]   ;;  %s3323_s3 = inlined_call_operand.vmem [shape: f32[3,128,128], index: 3, kind: input, shape index: {}]   ;;  %s3324_s4 = inlined_call_operand.vmem [shape: f32[1,128], index: 4, kind: input, shape index: {}]   ;;  %s3325_s5 = inlined_call_operand.vmem [shape: f32[128,4], index: 5, kind: input, shape index: {}]   ;;  %s3326_s6 = inlined_call_operand.vmem [shape: f32[1,4], index: 6, kind: input, shape index: {}]   ;;  %s3327_s7 = inlined_call_operand.vmem [shape: f32[4,128], index: 7, kind: input, shape index: {}]   ;;  %s3328_s8 = inlined_call_operand.vmem [shape: f32[1,128], index: 8, kind: input, shape index: {}]   ;;  %s3329_s9 = inlined_call_operand.vmem [shape: f32[128,128], index: 9, kind: input, shape index: {}]   ;;  %s3330_s10 = inlined_call_operand.vmem [shape: f32[128,128], index: 10, kind: input, shape index: {}]   ;;  %s3331_s11 = inlined_call_operand.vmem [shape: f32[1,128], index: 11, kind: input, shape index: {}]   ;;  %s3332_s12 = inlined_call_operand.vmem [shape: f32[2,16,128], index: 12, kind: output, shape index: {}]  }
   0x1 LB: > { %s1760_s22 = sadd.s32 4294967295, %s2709_s21   ;;  %p1764_p0 = scmp.ge.s32.totalorder %s2709_s21, 1  ;;  %s2709_s21 = sphi %s2779_s21, %s22_s21  }
   0x2   : > { %p362_p1 = scmp.lt.s32.totalorder %s2709_s21, 3 }
   0x4   : > { %p363_p2 = pnand %p1764_p0, %p362_p1 }
   0x5   : > { %p404_p3 = scmp.lt.s32.totalorder (!%p363_p2), %s1760_s22, 1  ;;  %v416_v0 = vlaneseq (!%p363_p2)  ;;  %v1777_v1 = vld [vmem:[%s3321_s1 + $0x80] sm:$0xff] (!%p363_p2)  ;;  %v1778_v2 = vld [vmem:[%s3321_s1 + $0x88] sm:$0xff] (!%p363_p2)  ;;  %v1779_v3 = vld [vmem:[%s3321_s1 + $0x90] sm:$0xff] (!%p363_p2)  ;;  %vm436_vm0 = vcmask (!%p363_p2), 130048   ;;  %v2711_v20 = vmov (!%p363_p2), 0.0  }
   0x6   : > { %366 = sbr.rel (%p363_p2) target bundleno = 1680 (0x690), region = 68  ;;  %v2390_v4 = vpack.c.bf16 (!%p363_p2), %v1778_v2, %v1777_v1  ;;  %v1780_v5 = vld [vmem:[%s3321_s1 + $0x98] sm:$0xff] (!%p363_p2)  ;;  %v1781_v9 = vld [vmem:[%s3321_s1 + $0xa0] sm:$0xff] (!%p363_p2)  ;;  %v1782_v10 = vld [vmem:[%s3321_s1 + $0xa8] sm:$0xff] (!%p363_p2)  ;;  %vm2713_vm5 = vmmov (!%p363_p2), 0   ;;  %vm1424_vm6 = vcmask (!%p363_p2), 1043456  }
   0x7   : > { %v2801_v6 = vshrl.u32 (!%p363_p2), %v416_v0, 7  ;;  %v420_v7 = vand.u32 (!%p363_p2), 127, %v416_v0  ;;  %v2394_v8 = vpack.c.bf16 (!%p363_p2), %v1780_v5, %v1779_v3  ;;  %v2398_v14 = vpack.c.bf16 (!%p363_p2), %v1782_v10, %v1781_v9  ;;  %v1783_v15 = vld [vmem:[%s3321_s1 + $0xb0] sm:$0xff] (!%p363_p2)  ;;  %v1784_v18 = vld [vmem:[%s3321_s1 + $0xb8] sm:$0xff] (!%p363_p2)  ;;  %v1785_v25 = vld [vmem:[%s3321_s1 + $0xc0] sm:$0xff] (!%p363_p2) }
   0x8   : > { %2391 = vmatprep.subr.bf16.mxu0 (!%p363_p2), %v2390_v4  ;;  %v2402_v23 = vpack.c.bf16 (!%p363_p2), %v1784_v18, %v1783_v15  ;;  %v1786_v26 = vld [vmem:[%s3321_s1 + $0xc8] sm:$0xff] (!%p363_p2)  ;;  %v1787_v30 = vld [vmem:[%s3321_s1 + $0xd0] sm:$0xff] (!%p363_p2)  ;;  %v1788_v31 = vld [vmem:[%s3321_s1 + $0xd8] sm:$0xff] (!%p363_p2)  ;;  %vm1420_vm7 = vcmask (!%p363_p2), 31744  }
   0x9   : > { %v421_v11 = vadd.s32 (!%p363_p2), 1, %v420_v7  ;;  %v418_v12 = vadd.s32 (!%p363_p2), 8, %v2801_v6  ;;  %v428_v13 = vadd.s32 (!%p363_p2), 1, %v2801_v6  ;;  %2393 = vmatpush3.bf16.msra.mxu0 (!%p363_p2), %v2390_v4  ;;  %v2406_v28 = vpack.c.bf16 (!%p363_p2), %v1786_v26, %v1785_v25  ;;  %v1789_v33 = vld [vmem:[%s3321_s1 + $0xe0] sm:$0xff] (!%p363_p2)  ;;  %v1790_v34 = vld [vmem:[%s3321_s1 + $0xe8] sm:$0xff] (!%p363_p2)  ;;  %v1791_v36 = vld [vmem:[%s3321_s1 + $0xf0] sm:$0xff] (!%p363_p2) }
   0xa   : > { %2395 = vmatprep.subr.bf16.mxu0 (!%p363_p2), %v2394_v8  ;;  %v2410_v32 = vpack.c.bf16 (!%p363_p2), %v1788_v31, %v1787_v30  ;;  %v2414_v35 = vpack.c.bf16 (!%p363_p2), %v1790_v34, %v1789_v33  ;;  %v1792_v37 = vld [vmem:[%s3321_s1 + $0xf8] sm:$0xff] (!%p363_p2)  ;;  %v599_v39 = vld [vmem:[%s3321_s1] sm:$0xff] (!%p363_p2)  ;;  %v600_v40 = vld [vmem:[%s3321_s1 + $0x8] sm:$0xff] (!%p363_p2) }
   0xb   : > { %vm422_vm1 = vcmp.eq.s32.totalorder (!%p363_p2), %v2801_v6, %v421_v11  ;;  %vm423_vm2 = vcmp.eq.s32.totalorder (!%p363_p2), %v418_v12, %v421_v11  ;;  %v429_v22 = vadd.s32 (!%p363_p2), 1, %v418_v12  ;;  %vm430_vm3 = vcmp.eq.s32.totalorder (!%p363_p2), %v428_v13, %v420_v7  ;;  %v601_v42 = vld [vmem:[%s3321_s1 + $0x10] sm:$0xff] (!%p363_p2)  ;;  %v602_v43 = vld [vmem:[%s3321_s1 + $0x18] sm:$0xff] (!%p363_p2)  ;;  %v603_v45 = vld [vmem:[%s3321_s1 + $0x20] sm:$0xff] (!%p363_p2) }
   0xc   : > { %v1769_v21 = vsel (!%p363_p2), %vm422_vm1, 1.0, %v2711_v20  ;;  %v2834_v24 = vsel (!%p363_p2), %vm423_vm2, 1.0, %v2711_v20  ;;  %v2843_v27 = vsel (!%p363_p2), %vm430_vm3, 1.0, %v2711_v20  ;;  %v2418_v38 = vpack.c.bf16 (!%p363_p2), %v1792_v37, %v1791_v36  ;;  %v604_v46 = vld [vmem:[%s3321_s1 + $0x28] sm:$0xff] (!%p363_p2)  ;;  %v605_v48 = vld [vmem:[%s3321_s1 + $0x30] sm:$0xff] (!%p363_p2)  ;;  %v606_v49 = vld [vmem:[%s3321_s1 + $0x38] sm:$0xff] (!%p363_p2) }
   0xd   : > { %s3334_s22 = smov (!%p404_p3, %s1760_s22), 1  ;;  %2038 = vmatprep.mubr.msk.f32.mxu1 %vm436_vm0, %v1769_v21  ;;  %2397 = vmatpush3.bf16.msra.mxu0 %v2394_v8  ;;  %vm431_vm4 = vcmp.eq.s32.totalorder %v429_v22, %v420_v7  ;;  %v2422_v41 = vpack.c.bf16 %v600_v40, %v599_v39  ;;  %v2426_v44 = vpack.c.bf16 %v602_v43, %v601_v42  ;;  %v607_v51 = vld [vmem:[%s3321_s1 + $0x40] sm:$0xff]  ;;  %v608_v52 = vld [vmem:[%s3321_s1 + $0x48] sm:$0xff]  ;;  %v609_v54 = vld [vmem:[%s3321_s1 + $0x50] sm:$0xff] }
   0xe   : > { %s1853_s17 = sshll.u32 %s3334_s22, 4  ;;  %2399 = vmatprep.subr.bf16.mxu0 %v2398_v14  ;;  %v2850_v29 = vsel %vm431_vm4, 1.0, %v2711_v20  ;;  %v2430_v47 = vpack.c.bf16 %v604_v46, %v603_v45  ;;  %v2434_v50 = vpack.c.bf16 %v606_v49, %v605_v48  ;;  %v2438_v53 = vpack.c.bf16 %v608_v52, %v607_v51  ;;  %v610_v55 = vld [vmem:[%s3321_s1 + $0x58] sm:$0xff]  ;;  %v611_v57 = vld [vmem:[%s3321_s1 + $0x60] sm:$0xff]  ;;  %v612_v58 = vld [vmem:[%s3321_s1 + $0x68] sm:$0xff] }
   0xf   : > { %s408_s20 = scalar_lea.vmem %s3320_s0, %s1853_s17  ;;  %v2442_v56 = vpack.c.bf16 %v610_v55, %v609_v54  ;;  %v2446_v59 = vpack.c.bf16 %v612_v58, %v611_v57  ;;  %v613_v60 = vld [vmem:[%s3321_s1 + $0x70] sm:$0xff]  ;;  %v614_v61 = vld [vmem:[%s3321_s1 + $0x78] sm:$0xff]  ;;  %v1793_v63 = vld [vmem:[%s3321_s1 + $0x100] sm:$0xff]  ;;  %s413_s28 = scalar_lea.vmem %s3332_s12, %s1853_s17 }
  0x10   : > { %v2820_v16 = vld [vmem:[%s408_s20] sm:$0xff]  ;;  %v2822_v17 = vld [vmem:[%s408_s20 + $0x8] sm:$0xff]  ;;  %v2450_v62 = vpack.c.bf16 %v614_v61, %v613_v60  ;;  %v1795_v2 = vld [vmem:[%s3321_s1 + $0x110] sm:$0xff] }
  0x11   : > { %v2382_v19 = vpack.c.bf16 %v2822_v17, %v2820_v16  ;;  %2080 = vmatprep.mubr.f32.mxu0 %v2820_v16  ;;  %2401 = vmatpush3.bf16.msra.mxu0 %v2398_v14  ;;  %v1794_v0 = vld [vmem:[%s3321_s1 + $0x108] sm:$0xff]  ;;  %v1796_v3 = vld [vmem:[%s3321_s1 + $0x118] sm:$0xff]  ;;  %v1797_v8 = vld [vmem:[%s3321_s1 + $0x120] sm:$0xff] }
  0x12   : > { %2403 = vmatprep.subr.bf16.mxu0 %v2402_v23  ;;  %v2454_v1 = vpack.c.bf16 %v1794_v0, %v1793_v63  ;;  %v2458_v7 = vpack.c.bf16 %v1796_v3, %v1795_v2  ;;  %v1798_v9 = vld [vmem:[%s3321_s1 + $0x128] sm:$0xff]  ;;  %v1799_v13 = vld [vmem:[%s3321_s1 + $0x130] sm:$0xff]  ;;  %v1800_v14 = vld [vmem:[%s3321_s1 + $0x138] sm:$0xff] }
  0x13   : > { %2383 = vmatprep.subr.bf16.mxu1 %v2382_v19  ;;  %v2462_v11 = vpack.c.bf16 %v1798_v9, %v1797_v8  ;;  %v2466_v15 = vpack.c.bf16 %v1800_v14, %v1799_v13  ;;  %v1801_v18 = vld [vmem:[%s3321_s1 + $0x140] sm:$0xff]  ;;  %v1803_v22 = vld [vmem:[%s3321_s1 + $0x150] sm:$0xff]  ;;  %v1038_v3 = vld [vmem:[%s3323_s3 + $0x8] sm:$0xff] }
  0x14   : > { %2385 = vmatpush3.bf16.msra.mxu1 %v2382_v19  ;;  %v1805_v26 = vld [vmem:[%s3321_s1 + $0x160] sm:$0xff]  ;;  %v1807_v31 = vld [vmem:[%s3321_s1 + $0x170] sm:$0xff] }
  0x15   : > { %2387 = vmatprep.subr.bf16.mxu1 %v2382_v19  ;;  %2405 = vmatpush3.bf16.msra.mxu0 %v2402_v23  ;;  %v1804_v23 = vld [vmem:[%s3321_s1 + $0x158] sm:$0xff]  ;;  %v1814_v34 = vld [vmem:[%s3323_s3 + $0x80] sm:$0xff]  ;;  %v1816_v37 = vld [vmem:[%s3323_s3 + $0x90] sm:$0xff] }
  0x16   : > { %2407 = vmatprep.subr.bf16.mxu0 %v2406_v28  ;;  %v2474_v25 = vpack.c.bf16 %v1804_v23, %v1803_v22  ;;  %v1818_v40 = vld [vmem:[%s3323_s3 + $0xa0] sm:$0xff]  ;;  %v1820_v43 = vld [vmem:[%s3323_s3 + $0xb0] sm:$0xff]  ;;  %v1050_v22 = vld [vmem:[%s3323_s3 + $0x68] sm:$0xff] }
  0x17   : > { %2039 = vmatmul.mubr.msk.f32.vlgmr.msra.gmra.mrb[0].mxu1 %vm436_vm0, %v2834_v24  ;;  %v1822_v46 = vld [vmem:[%s3323_s3 + $0xc0] sm:$0xff]  ;;  %v1824_v49 = vld [vmem:[%s3323_s3 + $0xd0] sm:$0xff] }
  0x18   : > { %2389 = vmatpush3.bf16.msra.mxu1 %v2382_v19  ;;  %2045 = vmatprep.mubr.msk.f32.mxu1 %vm436_vm0, %v2843_v27  ;;  %v1802_v19 = vld [vmem:[%s3321_s1 + $0x148] sm:$0xff]  ;;  %v1826_v52 = vld [vmem:[%s3323_s3 + $0xe0] sm:$0xff]  ;;  %v1828_v55 = vld [vmem:[%s3323_s3 + $0xf0] sm:$0xff] }
  0x19   : > { %2409 = vmatpush3.bf16.msra.mxu0 %v2406_v28  ;;  %v1806_v28 = vld [vmem:[%s3321_s1 + $0x168] sm:$0xff]  ;;  %v1809_v58 = vld [vmem:[%s3322_s2] ss:$0 sm:$0xff] }
  0x1a   : > { %2411 = vmatprep.subr.bf16.mxu0 %v2410_v32  ;;  %v2478_v30 = vpack.c.bf16 %v1806_v28, %v1805_v26  ;;  %v1037_v2 = vld [vmem:[%s3323_s3] sm:$0xff]  ;;  %v1052_v26 = vld [vmem:[%s3323_s3 + $0x78] sm:$0xff] }
  0x1b   : > { %2046 = vmatmul.mubr.msk.f32.vlgmr.msra.gmra.mrb[2].mxu1 %vm436_vm0, %v2850_v29  ;;  %v1041_v9 = vld [vmem:[%s3323_s3 + $0x20] sm:$0xff] }
  0x1c   : > { %2157 = vmatprep.mubr.msk.f32.mxu1 %vm436_vm0, %v1769_v21  ;;  %v2470_v21 = vpack.c.bf16 %v1802_v19, %v1801_v18  ;;  %v1045_v13 = vld [vmem:[%s3323_s3 + $0x40] sm:$0xff]  ;;  %v1048_v18 = vld [vmem:[%s3323_s3 + $0x58] sm:$0xff] }
  0x1d   : > { %2413 = vmatpush3.bf16.msra.mxu0 %v2410_v32  ;;  %v1808_v32 = vld [vmem:[%s3321_s1 + $0x178] sm:$0xff] }
  0x1e   : > { %2415 = vmatprep.subr.bf16.mxu0 %v2414_v35  ;;  %v2482_v33 = vpack.c.bf16 %v1808_v32, %v1807_v31  ;;  %v1831_v31 = vld [vmem:[%s3323_s3 + $0x108] sm:$0xff] }
  0x21   : > { %2417 = vmatpush3.bf16.msra.mxu0 %v2414_v35  ;;  %v1815_v35 = vld [vmem:[%s3323_s3 + $0x88] sm:$0xff] }
  0x22   : > { %2419 = vmatprep.subr.bf16.mxu0 %v2418_v38  ;;  %v2494_v36 = vpack.c.bf16 %v1815_v35, %v1814_v34  ;;  %v1331_v34 = vld [vmem:[%s3325_s5 + $0x8] sm:$0xff]  ;;  %v1332_v35 = vld [vmem:[%s3325_s5 + $0x10] sm:$0xff] }
  0x25   : > { %2421 = vmatpush3.bf16.msra.mxu0 %v2418_v38  ;;  %v1817_v38 = vld [vmem:[%s3323_s3 + $0x98] sm:$0xff] }
  0x26   : > { %2423 = vmatprep.subr.bf16.mxu0 %v2422_v41  ;;  %v2498_v39 = vpack.c.bf16 %v1817_v38, %v1816_v37  ;;  %v1333_v38 = vld [vmem:[%s3325_s5 + $0x18] sm:$0xff] }
  0x28   : > { %2081 = vmatmul.mubr.f32.vlgmr.msra.gmra.mrb[0].mxu0 %v2822_v17 }
  0x29   : > { %2425 = vmatpush3.bf16.msra.mxu0 %v2422_v41  ;;  %v1819_v41 = vld [vmem:[%s3323_s3 + $0xa8] sm:$0xff] }
  0x2a   : > { %2427 = vmatprep.subr.bf16.mxu0 %v2426_v44  ;;  %v2502_v42 = vpack.c.bf16 %v1819_v41, %v1818_v40  ;;  %v1334_v40 = vld [vmem:[%s3325_s5 + $0x20] sm:$0xff]  ;;  %v1335_v41 = vld [vmem:[%s3325_s5 + $0x28] sm:$0xff] }
  0x2d   : > { %2429 = vmatpush3.bf16.msra.mxu0 %v2426_v44  ;;  %v1821_v44 = vld [vmem:[%s3323_s3 + $0xb8] sm:$0xff] }
  0x2e   : > { %2431 = vmatprep.subr.bf16.mxu0 %v2430_v47  ;;  %v2506_v45 = vpack.c.bf16 %v1821_v44, %v1820_v43 }
  0x31   : > { %2433 = vmatpush3.bf16.msra.mxu0 %v2430_v47  ;;  %v1823_v47 = vld [vmem:[%s3323_s3 + $0xc8] sm:$0xff] }
  0x32   : > { %2435 = vmatprep.subr.bf16.mxu0 %v2434_v50  ;;  %v2510_v48 = vpack.c.bf16 %v1823_v47, %v1822_v46  ;;  %v1833_v46 = vld [vmem:[%s3323_s3 + $0x118] sm:$0xff] }
  0x35   : > { %2437 = vmatpush3.bf16.msra.mxu0 %v2434_v50  ;;  %v1825_v50 = vld [vmem:[%s3323_s3 + $0xd8] sm:$0xff] }
  0x36   : > { %2439 = vmatprep.subr.bf16.mxu0 %v2438_v53  ;;  %v2514_v51 = vpack.c.bf16 %v1825_v50, %v1824_v49  ;;  %v1834_v50 = vld [vmem:[%s3323_s3 + $0x120] sm:$0xff] }
  0x39   : > { %2441 = vmatpush3.bf16.msra.mxu0 %v2438_v53  ;;  %v1827_v53 = vld [vmem:[%s3323_s3 + $0xe8] sm:$0xff] }
  0x3a   : > { %2443 = vmatprep.subr.bf16.mxu0 %v2442_v56  ;;  %v2518_v54 = vpack.c.bf16 %v1827_v53, %v1826_v52 }
  0x3d   : > { %2445 = vmatpush3.bf16.msra.mxu0 %v2442_v56  ;;  %v1829_v56 = vld [vmem:[%s3323_s3 + $0xf8] sm:$0xff] }
  0x3e   : > { %2447 = vmatprep.subr.bf16.mxu0 %v2446_v59  ;;  %v2522_v57 = vpack.c.bf16 %v1829_v56, %v1828_v55  ;;  %v1836_v55 = vld [vmem:[%s3323_s3 + $0x130] sm:$0xff]  ;;  %v1837_v56 = vld [vmem:[%s3323_s3 + $0x138] sm:$0xff] }
  0x41   : > { %2449 = vmatpush3.bf16.msra.mxu0 %v2446_v59 }
  0x42   : > { %2451 = vmatprep.subr.bf16.mxu0 %v2450_v62 }
  0x45   : > { %2453 = vmatpush3.bf16.msra.mxu0 %v2450_v62 }
  0x46   : > { %2455 = vmatprep.subr.bf16.mxu0 %v2454_v1 }
  0xea   : > { %v2040_v4 = vpop.f32.mrb[0].mxu1 }
  0xeb   : > { %v509_v5 = vpop.f32.mrb[1].mxu1 }
  0xec   : > { %2115 = vmatprep.mubr.f32.mxu0 %v509_v5  ;;  %v1039_v5 = vld [vmem:[%s3323_s3 + $0x10] sm:$0xff] }
  0xed   : > { %2116 = vmatmul.mubr.f32.vlgmr.msra.gmra.mrb[0].mxu0 %v2040_v4  ;;  %v2526_v4 = vpack.c.bf16 %v1038_v3, %v1037_v2  ;;  %v1844_v3 = vld [vmem:[%s3323_s3 + $0x170] sm:$0xff] }
  0xee   : > { %2457 = vmatpush3.bf16.msra.mxu0 %v2454_v1  ;;  %v2047_v10 = vpop.f32.mrb[2].mxu1 }
  0xef   : > { %2459 = vmatprep.subr.bf16.mxu0 %v2458_v7  ;;  %v590_v12 = vpop.f32.mrb[3].mxu1 }
  0xf0   : > { %2150 = vmatprep.mubr.f32.mxu0 %v590_v12 }
  0xf2   : > { %2461 = vmatpush3.bf16.msra.mxu0 %v2458_v7  ;;  %v1040_v7 = vld [vmem:[%s3323_s3 + $0x18] sm:$0xff] }
  0xf3   : > { %2463 = vmatprep.subr.bf16.mxu0 %v2462_v11  ;;  %v2530_v8 = vpack.c.bf16 %v1040_v7, %v1039_v5  ;;  %v1336_v7 = vld [vmem:[%s3325_s5 + $0x30] sm:$0xff] }
  0xf6   : > { %2465 = vmatpush3.bf16.msra.mxu0 %v2462_v11  ;;  %v1044_v11 = vld [vmem:[%s3323_s3 + $0x38] sm:$0xff] }
  0xf7   : > { %2467 = vmatprep.subr.bf16.mxu0 %v2466_v15 }
  0xfa   : > { %2469 = vmatpush3.bf16.msra.mxu0 %v2466_v15  ;;  %v1047_v15 = vld [vmem:[%s3323_s3 + $0x50] sm:$0xff] }
  0xfb   : > { %2471 = vmatprep.subr.bf16.mxu0 %v2470_v21  ;;  %v2546_v19 = vpack.c.bf16 %v1048_v18, %v1047_v15  ;;  %v1344_v18 = vld [vmem:[%s3325_s5 + $0x70] sm:$0xff] }
  0xfe   : > { %2473 = vmatpush3.bf16.msra.mxu0 %v2470_v21  ;;  %v1049_v21 = vld [vmem:[%s3323_s3 + $0x60] sm:$0xff] }
  0xff   : > { %2475 = vmatprep.subr.bf16.mxu0 %v2474_v25  ;;  %v2550_v23 = vpack.c.bf16 %v1050_v22, %v1049_v21 }
 0x102   : > { %2477 = vmatpush3.bf16.msra.mxu0 %v2474_v25  ;;  %v1051_v25 = vld [vmem:[%s3323_s3 + $0x70] sm:$0xff] }
 0x103   : > { %2479 = vmatprep.subr.bf16.mxu0 %v2478_v30  ;;  %v2554_v28 = vpack.c.bf16 %v1052_v26, %v1051_v25 }
 0x106   : > { %2481 = vmatpush3.bf16.msra.mxu0 %v2478_v30  ;;  %v1830_v30 = vld [vmem:[%s3323_s3 + $0x100] sm:$0xff] }
 0x107   : > { %2483 = vmatprep.subr.bf16.mxu0 %v2482_v33  ;;  %v2558_v32 = vpack.c.bf16 %v1831_v31, %v1830_v30 }
 0x10a   : > { %2485 = vmatpush3.bf16.msra.mxu0 %v2482_v33  ;;  %v1330_v33 = vld [vmem:[%s3325_s5] sm:$0xff] }
 0x10b   : > { %2495 = vmatprep.subr.bf16.mxu0 %v2494_v36  ;;  %v2591_v37 = vpack.c.bf16 %v1331_v34, %v1330_v33 }
 0x10d   : > { %2151 = vmatmul.mubr.f32.vlgmr.msra.gmra.mrb[0].mxu0 %v2047_v10  ;;  %v1042_v10 = vld [vmem:[%s3323_s3 + $0x28] sm:$0xff] }
 0x10e   : > { %2497 = vmatpush3.bf16.msra.mxu0 %v2494_v36  ;;  %v2712_v36 = vmov 0.0|0.0  }
 0x10f   : > { %2499 = vmatprep.subr.bf16.mxu0 %v2498_v39 }
 0x112   : > { %2501 = vmatpush3.bf16.msra.mxu0 %v2498_v39  ;;  %v2594_v39 = vpack.c.bf16 %v1333_v38, %v1332_v35  ;;  %v1418_v38 = vld [vmem:[%s3327_s7] sm:$0xf] }
 0x113   : > { %2503 = vmatprep.subr.bf16.mxu0 %v2502_v42 }
 0x116   : > { %2505 = vmatpush3.bf16.msra.mxu0 %v2502_v42  ;;  %v2597_v42 = vpack.c.bf16 %v1335_v41, %v1334_v40 }
 0x117   : > { %2507 = vmatprep.subr.bf16.mxu0 %v2506_v45 }
 0x11a   : > { %2509 = vmatpush3.bf16.msra.mxu0 %v2506_v45  ;;  %v1832_v45 = vld [vmem:[%s3323_s3 + $0x110] sm:$0xff] }
 0x11b   : > { %2511 = vmatprep.subr.bf16.mxu0 %v2510_v48  ;;  %v2562_v49 = vpack.c.bf16 %v1833_v46, %v1832_v45  ;;  %v1527_v45 = vld [vmem:[%s3330_s10 + $0x8] sm:$0xff] }
 0x11e   : > { %2513 = vmatpush3.bf16.msra.mxu0 %v2510_v48 }
 0x11f   : > { %2515 = vmatprep.subr.bf16.mxu0 %v2514_v51 }
 0x122   : > { %2517 = vmatpush3.bf16.msra.mxu0 %v2514_v51  ;;  %v1835_v51 = vld [vmem:[%s3323_s3 + $0x128] sm:$0xff] }
 0x123   : > { %2519 = vmatprep.subr.bf16.mxu0 %v2518_v54  ;;  %v2566_v53 = vpack.c.bf16 %v1835_v51, %v1834_v50  ;;  %v1530_v50 = vld [vmem:[%s3330_s10 + $0x20] sm:$0xff]  ;;  %v1531_v51 = vld [vmem:[%s3330_s10 + $0x28] sm:$0xff] }
 0x126   : > { %2521 = vmatpush3.bf16.msra.mxu0 %v2518_v54 }
 0x127   : > { %2523 = vmatprep.subr.bf16.mxu0 %v2522_v57 }
 0x12a   : > { %2525 = vmatpush3.bf16.msra.mxu0 %v2522_v57  ;;  %v2570_v57 = vpack.c.bf16 %v1837_v56, %v1836_v55  ;;  %v1534_v56 = vld [vmem:[%s3330_s10 + $0x40] sm:$0xff] }
 0x12b   : > { %2590 = vmatprep.subr.bf16.mxu0 %v2712_v36 }
 0x1e0   : > { %v2152_v59 = vpop.f32.mrb[0].mxu0 }
 0x1e1   : > { %v884_v60 = vadd.f32 %v2152_v59, %v1809_v58  ;;  %v865_v61 = vpop.f32.mrb[1].mxu0  ;;  %v1839_v59 = vld [vmem:[%s3323_s3 + $0x148] sm:$0xff] }
 0x1e2   : > { %v883_v62 = vadd.f32 %v1809_v58, %v865_v61  ;;  %v1838_v58 = vld [vmem:[%s3323_s3 + $0x140] sm:$0xff]  ;;  %v1840_v61 = vld [vmem:[%s3323_s3 + $0x150] sm:$0xff] }
 0x1e3   : > { %v886_v63 = vmax.f32 %v884_v60, 0.0  ;;  %v2574_v60 = vpack.c.bf16 %v1839_v59, %v1838_v58  ;;  %v1536_v59 = vld [vmem:[%s3330_s10 + $0x50] sm:$0xff] }
 0x1e4   : > { %v885_v0 = vmax.f32 %v883_v62, 0.0  ;;  %v1841_v62 = vld [vmem:[%s3323_s3 + $0x158] sm:$0xff] }
 0x1e6   : > { %v2486_v1 = vpack.c.bf16 %v886_v63, %v885_v0  ;;  %2199 = vmatprep.mubr.f32.mxu0 %v885_v0  ;;  %v1842_v0 = vld [vmem:[%s3323_s3 + $0x160] sm:$0xff] }
 0x1e7   : > { %2200 = vmatmul.mubr.f32.vlgmr.msra.gmra.mrb[2].mxu0 %v886_v63  ;;  %v2578_v63 = vpack.c.bf16 %v1841_v62, %v1840_v61  ;;  %v1538_v61 = vld [vmem:[%s3330_s10 + $0x60] sm:$0xff] }
 0x1e8   : > { %2487 = vmatprep.subr.bf16.mxu1 %v2486_v1  ;;  %2592 = vmatpush3.bf16.msra.mxu0 %v2591_v37 }
 0x1e9   : > { %2489 = vmatpush3.bf16.msra.mxu1 %v2486_v1  ;;  %2593 = vmatprep.subr.bf16.mxu0 %v2712_v36 }
 0x1ea   : > { %2491 = vmatprep.subr.bf16.mxu1 %v2486_v1  ;;  %2304 = vmatprep.mubr.msk.f32.mxu0 %vm2713_vm5, %v2711_v20 }
 0x1ec   : > { %2158 = vmatmul.mubr.msk.f32.vlgmr.msra.gmra.mrb[4].mxu1 %vm436_vm0, %v2834_v24  ;;  %v2534_v24 = vpack.c.bf16 %v1042_v10, %v1041_v9  ;;  %2595 = vmatpush3.bf16.msra.mxu0 %v2594_v39  ;;  %v1338_v10 = vld [vmem:[%s3325_s5 + $0x40] sm:$0xff] }
 0x1ed   : > { %2493 = vmatpush3.bf16.msra.mxu1 %v2486_v1  ;;  %2164 = vmatprep.mubr.msk.f32.mxu1 %vm436_vm0, %v2843_v27  ;;  %v1043_v27 = vld [vmem:[%s3323_s3 + $0x30] sm:$0xff]  ;;  %v1843_v1 = vld [vmem:[%s3323_s3 + $0x168] sm:$0xff]  ;;  %v1346_v39 = vld [vmem:[%s3326_s6] sm:$0x1] }
 0x1ee   : > { %2527 = vmatprep.subr.bf16.mxu1 %v2526_v4  ;;  %v2538_v12 = vpack.c.bf16 %v1044_v11, %v1043_v27  ;;  %2596 = vmatprep.subr.bf16.mxu0 %v2712_v36  ;;  %v2582_v2 = vpack.c.bf16 %v1843_v1, %v1842_v0  ;;  %v1340_v11 = vld [vmem:[%s3325_s5 + $0x50] sm:$0xff] }
 0x1ef   : > { %v1540_v1 = vld [vmem:[%s3330_s10 + $0x70] sm:$0xff] }
 0x1f0   : > { %2165 = vmatmul.mubr.msk.f32.vlgmr.msra.gmra.mrb[6].mxu1 %vm436_vm0, %v2850_v29  ;;  %v1046_v29 = vld [vmem:[%s3323_s3 + $0x48] sm:$0xff]  ;;  %2598 = vmatpush3.bf16.msra.mxu0 %v2597_v42 }
 0x1f1   : > { %2529 = vmatpush3.bf16.msra.mxu1 %v2526_v4  ;;  %v2542_v14 = vpack.c.bf16 %v1046_v29, %v1045_v13  ;;  %2599 = vmatprep.subr.bf16.mxu0 %v2712_v36  ;;  %v1845_v4 = vld [vmem:[%s3323_s3 + $0x178] sm:$0xff]  ;;  %v1342_v29 = vld [vmem:[%s3325_s5 + $0x60] sm:$0xff] }
 0x1f2   : > { %2531 = vmatprep.subr.bf16.mxu1 %v2530_v8  ;;  %v2586_v5 = vpack.c.bf16 %v1845_v4, %v1844_v3  ;;  %v1504_v4 = vld [vmem:[%s3329_s9] sm:$0xff] }
 0x1f5   : > { %2533 = vmatpush3.bf16.msra.mxu1 %v2530_v8  ;;  %v1337_v8 = vld [vmem:[%s3325_s5 + $0x38] sm:$0xff] }
 0x1f6   : > { %2535 = vmatprep.subr.bf16.mxu1 %v2534_v24  ;;  %v2600_v9 = vpack.c.bf16 %v1337_v8, %v1336_v7  ;;  %v1419_v8 = vld [vmem:[%s3328_s8] sm:$0x1] }
 0x1f8   : > { %2601 = vmatpush3.bf16.msra.mxu0 %v2600_v9 }
 0x1f9   : > { %2537 = vmatpush3.bf16.msra.mxu1 %v2534_v24  ;;  %2602 = vmatprep.subr.bf16.mxu0 %v2712_v36  ;;  %v1339_v24 = vld [vmem:[%s3325_s5 + $0x48] sm:$0xff] }
 0x1fa   : > { %2539 = vmatprep.subr.bf16.mxu1 %v2538_v12  ;;  %v2603_v27 = vpack.c.bf16 %v1339_v24, %v1338_v10 }
 0x1fc   : > { %2604 = vmatpush3.bf16.msra.mxu0 %v2603_v27 }
 0x1fd   : > { %2541 = vmatpush3.bf16.msra.mxu1 %v2538_v12  ;;  %2605 = vmatprep.subr.bf16.mxu0 %v2712_v36  ;;  %v1341_v12 = vld [vmem:[%s3325_s5 + $0x58] sm:$0xff] }
 0x1fe   : > { %2543 = vmatprep.subr.bf16.mxu1 %v2542_v14  ;;  %v2606_v13 = vpack.c.bf16 %v1341_v12, %v1340_v11 }
 0x200   : > { %2607 = vmatpush3.bf16.msra.mxu0 %v2606_v13  ;;  %v1522_v13 = vsub.s32 0, %v2801_v6  ;;  %v1508_v6 = vld [vmem:[%s3329_s9 + $0x20] sm:$0xff] }
 0x201   : > { %2545 = vmatpush3.bf16.msra.mxu1 %v2542_v14  ;;  %2608 = vmatprep.subr.bf16.mxu0 %v2712_v36  ;;  %v1343_v14 = vld [vmem:[%s3325_s5 + $0x68] sm:$0xff] }
 0x202   : > { %2547 = vmatprep.subr.bf16.mxu1 %v2546_v19  ;;  %v2609_v15 = vpack.c.bf16 %v1343_v14, %v1342_v29 }
 0x204   : > { %2610 = vmatpush3.bf16.msra.mxu0 %v2609_v15  ;;  %v1506_v15 = vld [vmem:[%s3329_s9 + $0x10] sm:$0xff] }
 0x205   : > { %2549 = vmatpush3.bf16.msra.mxu1 %v2546_v19  ;;  %v1345_v19 = vld [vmem:[%s3325_s5 + $0x78] sm:$0xff]  ;;  %2611 = vmatprep.subr.bf16.mxu0 %v2712_v36 }
 0x206   : > { %2551 = vmatprep.subr.bf16.mxu1 %v2550_v23  ;;  %v2612_v21 = vpack.c.bf16 %v1345_v19, %v1344_v18  ;;  %v1507_v18 = vld [vmem:[%s3329_s9 + $0x18] sm:$0xff] }
 0x208   : > { %2613 = vmatpush3.bf16.msra.mxu0 %v2612_v21 }
 0x209   : > { %2553 = vmatpush3.bf16.msra.mxu1 %v2550_v23  ;;  %v1846_v23 = vld [vmem:[%s3324_s4] ss:$0 sm:$0xff] }
 0x20a   : > { %2555 = vmatprep.subr.bf16.mxu1 %v2554_v28 }
 0x20d   : > { %2557 = vmatpush3.bf16.msra.mxu1 %v2554_v28 }
 0x20e   : > { %2559 = vmatprep.subr.bf16.mxu1 %v2558_v32 }
 0x2ba   : > { %v3103_v43 = vpop.f32.mrb[2].mxu0 }
 0x2bb   : > { %v3105_v44 = vpop.f32.mrb[3].mxu0 }
 0x2bf   : > { %v2159_v47 = vpop.f32.mrb[4].mxu1 }
 0x2c0   : > { %v953_v48 = vpop.f32.mrb[5].mxu1 }
 0x2c1   : > { %2234 = vmatprep.mubr.f32.mxu1 %v953_v48  ;;  %v1529_v48 = vld [vmem:[%s3330_s10 + $0x18] sm:$0xff] }
 0x2c2   : > { %2235 = vmatmul.mubr.f32.vlgmr.msra.gmra.mrb[8].mxu1 %v2159_v47  ;;  %v1528_v47 = vld [vmem:[%s3330_s10 + $0x10] sm:$0xff] }
 0x2c3   : > { %2561 = vmatpush3.bf16.msra.mxu1 %v2558_v32  ;;  %v2166_v52 = vpop.f32.mrb[6].mxu1 }
 0x2c4   : > { %2563 = vmatprep.subr.bf16.mxu1 %v2562_v49  ;;  %v1028_v54 = vpop.f32.mrb[7].mxu1 }
 0x2c5   : > { %2269 = vmatprep.mubr.f32.mxu1 %v1028_v54  ;;  %v1533_v54 = vld [vmem:[%s3330_s10 + $0x38] sm:$0xff] }
 0x2c7   : > { %2565 = vmatpush3.bf16.msra.mxu1 %v2562_v49  ;;  %v2618_v49 = vpack.c.bf16 %v1529_v48, %v1528_v47 }
 0x2c8   : > { %2567 = vmatprep.subr.bf16.mxu1 %v2566_v53 }
 0x2cb   : > { %2569 = vmatpush3.bf16.msra.mxu1 %v2566_v53  ;;  %v1532_v53 = vld [vmem:[%s3330_s10 + $0x30] sm:$0xff] }
 0x2cc   : > { %2571 = vmatprep.subr.bf16.mxu1 %v2570_v57  ;;  %v2626_v55 = vpack.c.bf16 %v1533_v54, %v1532_v53 }
 0x2cf   : > { %2573 = vmatpush3.bf16.msra.mxu1 %v2570_v57  ;;  %v1535_v57 = vld [vmem:[%s3330_s10 + $0x48] sm:$0xff] }
 0x2d0   : > { %2575 = vmatprep.subr.bf16.mxu1 %v2574_v60  ;;  %v2630_v58 = vpack.c.bf16 %v1535_v57, %v1534_v56 }
 0x2d3   : > { %2577 = vmatpush3.bf16.msra.mxu1 %v2574_v60  ;;  %v1537_v60 = vld [vmem:[%s3330_s10 + $0x58] sm:$0xff] }
 0x2d4   : > { %2579 = vmatprep.subr.bf16.mxu1 %v2578_v63  ;;  %v2634_v62 = vpack.c.bf16 %v1537_v60, %v1536_v59 }
 0x2d7   : > { %2581 = vmatpush3.bf16.msra.mxu1 %v2578_v63  ;;  %v1539_v63 = vld [vmem:[%s3330_s10 + $0x68] sm:$0xff] }
 0x2d8   : > { %2583 = vmatprep.subr.bf16.mxu1 %v2582_v2  ;;  %v2638_v0 = vpack.c.bf16 %v1539_v63, %v1538_v61 }
 0x2db   : > { %2585 = vmatpush3.bf16.msra.mxu1 %v2582_v2  ;;  %v1541_v2 = vld [vmem:[%s3330_s10 + $0x78] sm:$0xff] }
 0x2dc   : > { %2587 = vmatprep.subr.bf16.mxu1 %v2586_v5  ;;  %v2642_v3 = vpack.c.bf16 %v1541_v2, %v1540_v1 }
 0x2df   : > { %2589 = vmatpush3.bf16.msra.mxu1 %v2586_v5  ;;  %v1505_v5 = vld [vmem:[%s3329_s9 + $0x8] sm:$0xff] }
 0x2e0   : > { %2307 = vmatprep.subr.mxu1 %v2711_v20  ;;  %v2646_v7 = vpack.c.bf16 %v1505_v5, %v1504_v4 }
 0x2e2   : > { %2270 = vmatmul.mubr.f32.vlgmr.msra.gmra.mrb[8].mxu1 %v2166_v52  ;;  %v2622_v52 = vpack.c.bf16 %v1531_v51, %v1530_v50 }
 0x2e3   : > { %2309 = vmatprep.mubr.msk.f32.mxu1 %vm2713_vm5, %v2711_v20  ;;  %2308 = vmatpush3.msk.msra.mxu1 %vm1424_vm6, %v1418_v38  ;;  %v1517_v38 = vld [vmem:[%s3329_s9 + $0x68] sm:$0xff] }
 0x3b5   : > { %v2271_v22 = vpop.f32.mrb[8].mxu1 }
 0x3b6   : > { %v2678_v25 = vadd.f32 %v2271_v22, %v3103_v43  ;;  %v1303_v26 = vpop.f32.mrb[9].mxu1  ;;  %v2650_v22 = vpack.c.bf16 %v1507_v18, %v1506_v15 }
 0x3b7   : > { %v2679_v28 = vadd.f32 %v1303_v26, %v3105_v44  ;;  %v1526_v44 = vld [vmem:[%s3330_s10] sm:$0xff]  ;;  %v1510_v26 = vld [vmem:[%s3329_s9 + $0x30] sm:$0xff] }
 0x3b8   : > { %v3191_v30 = vadd.f32 %v2678_v25, %v1846_v23  ;;  %v2614_v46 = vpack.c.bf16 %v1527_v45, %v1526_v44 }
 0x3b9   : > { %v3193_v31 = vadd.f32 %v2679_v28, %v1846_v23  ;;  %v1509_v23 = vld [vmem:[%s3329_s9 + $0x28] sm:$0xff]  ;;  %v1511_v28 = vld [vmem:[%s3329_s9 + $0x38] sm:$0xff] }
 0x3ba   : > { %2615 = vmatprep.subr.bf16.mxu1 %v2614_v46  ;;  %v2654_v25 = vpack.c.bf16 %v1509_v23, %v1508_v6 }
 0x3bb   : > { %v1323_v32 = vadd.f32 %v3191_v30, %v3193_v31 }
 0x3bd   : > { %v1324_v33 = vrot.slane %v1323_v32, 4 }
 0x3bf   : > { %v1325_v20 = vadd.f32 %v1324_v33, %v1323_v32  ;;  %v2658_v32 = vpack.c.bf16 %v1511_v28, %v1510_v26  ;;  %v1512_v33 = vld [vmem:[%s3329_s9 + $0x40] sm:$0xff] }
 0x3c1   : > { %v1326_v34 = vrot.slane %v1325_v20, 2 }
 0x3c3   : > { %v1327_v35 = vadd.f32 %v1326_v34, %v1325_v20  ;;  %v1514_v34 = vld [vmem:[%s3329_s9 + $0x50] sm:$0xff] }
 0x3c5   : > { %v1328_v36 = vrot.slane %v1327_v35, 1 }
 0x3c7   : > { %v1329_v37 = vadd.f32 %v1328_v36, %v1327_v35  ;;  %v1515_v35 = vld [vmem:[%s3329_s9 + $0x58] sm:$0xff] }
 0x3c8   : > { %v2666_v36 = vpack.c.bf16 %v1515_v35, %v1514_v34 }
 0x3c9   : > { %2305 = vmatmul.mubr.f32.vlgmr.msra.gmra.mrb[4].mxu0 %v1329_v37  ;;  %v1516_v37 = vld [vmem:[%s3329_s9 + $0x60] sm:$0xff] }
 0x49c   : > { %v1413_v40 = vpop.f32.mrb[4].mxu0 }
 0x49d   : > { %v1414_v41 = vadd.f32 %v1413_v40, %v1346_v39  ;;  %v2306_v42 = vpop.f32.mrb[5].mxu0  ;;  %v2670_v39 = vpack.c.bf16 %v1517_v38, %v1516_v37  ;;  %v1518_v40 = vld [vmem:[%s3329_s9 + $0x70] sm:$0xff] }
 0x49f   : > { %v1417_v43 = vmax.f32 %v1414_v41, 0.0  ;;  %v1519_v41 = vld [vmem:[%s3329_s9 + $0x78] sm:$0xff] }
 0x4a0   : > { %v2674_v42 = vpack.c.bf16 %v1519_v41, %v1518_v40 }
 0x4a1   : > { %2310 = vmatmul.mubr.msk.f32.vlgmr.msra.gmra.mrb[10].mxu1 %vm1420_vm7, %v1417_v43  ;;  %v1850_v43 = vld [vmem:[%s3331_s11] ss:$0 sm:$0xff] }
 0x4a2   : > { %2617 = vmatpush3.bf16.msra.mxu1 %v2614_v46 }
 0x4a3   : > { %2619 = vmatprep.subr.bf16.mxu1 %v2618_v49 }
 0x4a6   : > { %2621 = vmatpush3.bf16.msra.mxu1 %v2618_v49 }
 0x4a7   : > { %2623 = vmatprep.subr.bf16.mxu1 %v2622_v52 }
 0x4aa   : > { %2625 = vmatpush3.bf16.msra.mxu1 %v2622_v52 }
 0x4ab   : > { %2627 = vmatprep.subr.bf16.mxu1 %v2626_v55 }
 0x4ae   : > { %2629 = vmatpush3.bf16.msra.mxu1 %v2626_v55 }
 0x4af   : > { %2631 = vmatprep.subr.bf16.mxu1 %v2630_v58 }
 0x4b2   : > { %2633 = vmatpush3.bf16.msra.mxu1 %v2630_v58 }
 0x4b3   : > { %2635 = vmatprep.subr.bf16.mxu1 %v2634_v62 }
 0x4b6   : > { %2637 = vmatpush3.bf16.msra.mxu1 %v2634_v62 }
 0x4b7   : > { %2639 = vmatprep.subr.bf16.mxu1 %v2638_v0 }
 0x4ba   : > { %2641 = vmatpush3.bf16.msra.mxu1 %v2638_v0 }
 0x4bb   : > { %2643 = vmatprep.subr.bf16.mxu1 %v2642_v3 }
 0x4be   : > { %2645 = vmatpush3.bf16.msra.mxu1 %v2642_v3 }
 0x4bf   : > { %2647 = vmatprep.subr.bf16.mxu1 %v2646_v7 }
 0x574   : > { %v1494_v9 = vpop.f32.mrb[10].mxu1 }
 0x575   : > { %v1495_v10 = vadd.f32 %v1494_v9, %v1419_v8  ;;  %v2311_v24 = vpop.f32.mrb[11].mxu1 }
 0x577   : > { %v1849_v27 = vmul.f32 -1.442695, %v1495_v10 }
 0x579   : > { %2699 = vpow2.f32 %v1849_v27 }
 0x583   : > { %v2700_v11 = vpop.eup %2699 }
 0x584   : > { %v1501_v12 = vadd.f32 1.0, %v2700_v11 }
 0x586   : > { %2701 = vrcp.f32 %v1501_v12 }
 0x590   : > { %v2702_v29 = vpop.eup %2701 }
 0x591   : > { %v1523_v14 = vrot.slane %v2702_v29, %v1522_v13 }
 0x593   : > { %v1524_v19 = vmul.f32 %v1523_v14, %v3193_v31  ;;  %v1525_v21 = vmul.f32 %v1523_v14, %v3191_v30 }
 0x595   : > { %2344 = vmatprep.mubr.f32.mxu1 %v1524_v19 }
 0x596   : > { %2345 = vmatmul.mubr.f32.vlgmr.msra.gmra.mrb[12].mxu1 %v1525_v21 }
 0x597   : > { %2649 = vmatpush3.bf16.msra.mxu1 %v2646_v7  ;;  %2379 = vmatprep.mubr.f32.mxu1 %v3193_v31  ;;  %v1513_v31 = vld [vmem:[%s3329_s9 + $0x48] sm:$0xff] }
 0x598   : > { %2651 = vmatprep.subr.bf16.mxu1 %v2650_v22  ;;  %v2662_v20 = vpack.c.bf16 %v1513_v31, %v1512_v33 }
 0x59b   : > { %2653 = vmatpush3.bf16.msra.mxu1 %v2650_v22 }
 0x59c   : > { %2655 = vmatprep.subr.bf16.mxu1 %v2654_v25 }
 0x59f   : > { %2657 = vmatpush3.bf16.msra.mxu1 %v2654_v25 }
 0x5a0   : > { %2659 = vmatprep.subr.bf16.mxu1 %v2658_v32 }
 0x5a3   : > { %2661 = vmatpush3.bf16.msra.mxu1 %v2658_v32 }
 0x5a4   : > { %2663 = vmatprep.subr.bf16.mxu1 %v2662_v20 }
 0x5a7   : > { %2665 = vmatpush3.bf16.msra.mxu1 %v2662_v20 }
 0x5a8   : > { %2667 = vmatprep.subr.bf16.mxu1 %v2666_v36 }
 0x5ab   : > { %2669 = vmatpush3.bf16.msra.mxu1 %v2666_v36 }
 0x5ac   : > { %2671 = vmatprep.subr.bf16.mxu1 %v2670_v39 }
 0x5af   : > { %2673 = vmatpush3.bf16.msra.mxu1 %v2670_v39 }
 0x5b0   : > { %2675 = vmatprep.subr.bf16.mxu1 %v2674_v42 }
 0x5b3   : > { %2677 = vmatpush3.bf16.msra.mxu1 %v2674_v42 }
 0x5b6   : > { %2380 = vmatmul.mubr.f32.vlgmr.msra.gmra.mrb[12].mxu1 %v3191_v30 }
 0x689   : > { %v2381_v44 = vpop.f32.mrb[12].mxu1 }
 0x68a   : > { %v1700_v45 = vadd.f32 %v2381_v44, %v1850_v43  ;;  %v1683_v46 = vpop.f32.mrb[13].mxu1 }
 0x68b   : > { %v1699_v47 = vadd.f32 %v1850_v43, %v1683_v46 }
 0x68c   : > { %v1702_v48 = vadd.f32 %v1700_v45, %v2822_v17 }
 0x68d   : > { %v1701_v49 = vadd.f32 %v1699_v47, %v2820_v16 }
 0x68e   : > { %1704 = vst [vmem:[%s413_s28 + $0x8] sm:$0xff] %v1702_v48 }
 0x68f   : > { %1703 = vst [vmem:[%s413_s28] sm:$0xff] %v1701_v49 }
 0x690 PF: > { %s22_s21 = sadd.s32 1, %s2709_s21  }
 0x691   : > { %p19_p4 = scmp.ge.s32.totalorder %s22_s21, 4  }
 0x693   :  { %21 = sbr.rel (!%p19_p4) target bundleno = 1 (0x1), region = 102 }

</bundles_post_ra>
